<compile_context>
chip_gen: v6e
topology: v6e:2x2x1
jax: 0.10.0
libtpu: 0.0.40
codegen_flags: <defaults>
</compile_context>

<pallas_src>
import functools

import jax
import jax.numpy as jnp
from jax import lax
from jax.experimental import pallas as pl
from jax.experimental.pallas import tpu as pltpu


_LANE = 128                       # vreg lane width: output last dim padded to this
_SUBLANE = 8                      # vreg sublane width: batch tile multiple of this
_VMEM_BUDGET = 48 * 1024 * 1024   # conservative for v7x (64 MiB physical VMEM)


def _round_up(x, m):
    return ((x + m - 1) // m) * m


def linear_kernel(x_ref, w_ref, b_ref, o_ref):
    # x_ref : (tb, F)      activation tile (tiled over batch)
    # w_ref : (O_pad, F)   full (lane-padded) weight, resident across the grid
    # b_ref : (1, O_pad)   lane-padded bias, broadcast over the batch tile
    # o_ref : (tb, O_pad)  lane-dense output tile
    #
    # Contract the feature dim of both operands directly (no transposed weight
    # copy in HBM); accumulate in f32 on the MXU.
    acc = lax.dot_general(
        x_ref[...], w_ref[...],
        dimension_numbers=(((1,), (1,)), ((), ())),
        preferred_element_type=jnp.float32,
    )
    o_ref[...] = (acc + b_ref[...]).astype(o_ref.dtype)


@functools.partial(jax.jit, static_argnames=("block_b",))
def linear_proximal_forward(x, weight, bias, *, block_b=512):
    """y = x @ weight.T + bias (weight: (out_dim, feature_dim), bias: (out_dim,))."""
    B, F = x.shape
    O, F_w = weight.shape
    assert F_w == F, "weight feature dim must match x"

    # ---- lane-dense output: pad out_dim to a multiple of 128 lanes -----------
    O_pad = _round_up(O, _LANE)
    if O_pad != O:
        weight = jnp.pad(weight, ((0, O_pad - O), (0, 0)))
        bias = jnp.pad(bias, (0, O_pad - O))
    bias2 = bias.reshape(1, O_pad)

    # ---- batch tile: multiple of 8 sublanes, VMEM-budgeted (v7x-aware) -------
    bytes_per_row = 4 * (F + O_pad)            # one x row + one y row (f32, dbl-buffered)
    resident = 2 * 4 * O_pad * (F + 1)         # weight + bias buffers
    max_tb = max(
        _SUBLANE,
        ((_VMEM_BUDGET - resident) // (2 * bytes_per_row)) // _SUBLANE * _SUBLANE,
    )
    tb = min(_round_up(block_b, _SUBLANE), max_tb, _round_up(B, _SUBLANE))

    # ---- pad batch so the grid tiles it exactly -------------------------------
    B_pad = _round_up(B, tb)
    if B_pad != B:
        x = jnp.pad(x, ((0, B_pad - B), (0, 0)))

    grid = (B_pad // tb,)

    y_pad = pl.pallas_call(
        linear_kernel,
        out_shape=jax.ShapeDtypeStruct((B_pad, O_pad), x.dtype),
        grid=grid,
        in_specs=[
            pl.BlockSpec((tb, F), lambda i: (i, 0)),       # x: tiled over batch
            pl.BlockSpec((O_pad, F), lambda i: (0, 0)),    # weight: resident
            pl.BlockSpec((1, O_pad), lambda i: (0, 0)),    # bias: resident
        ],
        out_specs=pl.BlockSpec((tb, O_pad), lambda i: (i, 0)),
        compiler_params=pltpu.CompilerParams(
            dimension_semantics=("parallel",),             # shard batch tiles across TCs (v7x)
            vmem_limit_bytes=_VMEM_BUDGET,
        ),
    )(x, weight, bias2)

    # Strip batch / out_dim padding back to the module's output shape.
    return y_pad[:B, :O]


if __name__ == "__main__":
    feature_dim = 40
    out_dim = 1
    batch = 8

    key = jax.random.PRNGKey(0)
    kx, kw, kb = jax.random.split(key, 3)

    # Deterministic parameter init, mimicking PyTorch nn.Linear default
    # (uniform in [-1/sqrt(fan_in), 1/sqrt(fan_in)]).
    bound = 1.0 / (feature_dim ** 0.5)
    weight = jax.random.uniform(kw, (out_dim, feature_dim),
                                minval=-bound, maxval=bound, dtype=jnp.float32)
    bias = jax.random.uniform(kb, (out_dim,),
                              minval=-bound, maxval=bound, dtype=jnp.float32)
    x = jax.random.normal(kx, (batch, feature_dim), dtype=jnp.float32)

    y = jax.block_until_ready(linear_proximal_forward(x, weight, bias))

    # Reference check against plain JAX (same math as the PyTorch forward).
    y_ref = x @ weight.T + bias
    assert y.shape == (batch, out_dim)
    assert jnp.allclose(y, y_ref, atol=1e-5, rtol=1e-5)

    print("KERNEL_OK")
</pallas_src>

<mosaic_0001>
module attributes {stable_mosaic.version = 11 : i64} {
  func.func @linear_kernel(%arg0: i32, %arg1: memref<8x40xf32, #tpu.memory_space<vmem>>, %arg2: memref<128x40xf32, #tpu.memory_space<vmem>>, %arg3: memref<1x128xf32, #tpu.memory_space<vmem>>, %arg4: memref<8x128xf32, #tpu.memory_space<vmem>>) attributes {dimension_semantics = [#tpu.dimension_semantics<parallel>], iteration_bounds = array<i64: 1>, scalar_prefetch = 0 : i64, scratch_operands = 0 : i64, tpu.core_type = #tpu.core_type<tc>, window_params = [{transform_indices = @transform_0, window_bounds = array<i64: 8, 40>}, {pipeline_mode = #tpu.pipeline_mode<synchronous>, transform_indices = @transform_1, window_bounds = array<i64: 128, 40>}, {pipeline_mode = #tpu.pipeline_mode<synchronous>, transform_indices = @transform_2, window_bounds = array<i64: 1, 128>}, {transform_indices = @transform_3, window_bounds = array<i64: 8, 128>}]} {
    %c0 = arith.constant 0 : index
    %c0_0 = arith.constant 0 : index
    %0 = vector.load %arg1[%c0, %c0_0] : memref<8x40xf32, #tpu.memory_space<vmem>>, vector<8x40xf32>
    %c0_1 = arith.constant 0 : index
    %c0_2 = arith.constant 0 : index
    %1 = vector.load %arg2[%c0_1, %c0_2] : memref<128x40xf32, #tpu.memory_space<vmem>>, vector<128x40xf32>
    %cst = arith.constant dense<0.000000e+00> : vector<8x128xf32>
    %2 = tpu.matmul %0, %1, %cst {dimension_numbers = #tpu.dot_dimension_numbers<[1], [1], [0], [0], [0, 0, 1, 0], [], []>} : vector<8x40xf32>, vector<128x40xf32>, vector<8x128xf32> -> vector<8x128xf32>
    %c0_3 = arith.constant 0 : index
    %c0_4 = arith.constant 0 : index
    %3 = vector.load %arg3[%c0_3, %c0_4] : memref<1x128xf32, #tpu.memory_space<vmem>>, vector<1x128xf32>
    %4 = vector.broadcast %3 : vector<1x128xf32> to vector<8x128xf32>
    %5 = arith.addf %2, %4 : vector<8x128xf32>
    %c0_5 = arith.constant 0 : index
    %c0_6 = arith.constant 0 : index
    %6 = vector.load %arg4[%c0_5, %c0_6] : memref<8x128xf32, #tpu.memory_space<vmem>>, vector<8x128xf32>
    tpu.vector_store %arg4[%c0_5, %c0_6], %5 {strides = array<i32>} : memref<8x128xf32, #tpu.memory_space<vmem>>, vector<8x128xf32>,
    return
  }
  func.func @transform_0(%arg0: i32) -> (i32, i32) {
    %c0_i32 = arith.constant 0 : i32
    %c0_i32_0 = arith.constant 0 : i32
    return %arg0, %c0_i32 : i32, i32
  }
  func.func @transform_1(%arg0: i32) -> (i32, i32) {
    %c0_i32 = arith.constant 0 : i32
    %c0_i32_0 = arith.constant 0 : i32
    %c0_i32_1 = arith.constant 0 : i32
    return %c0_i32, %c0_i32_0 : i32, i32
  }
  func.func @transform_2(%arg0: i32) -> (i32, i32) {
    %c0_i32 = arith.constant 0 : i32
    %c0_i32_0 = arith.constant 0 : i32
    %c0_i32_1 = arith.constant 0 : i32
    return %c0_i32, %c0_i32_0 : i32, i32
  }
  func.func @transform_3(%arg0: i32) -> (i32, i32) {
    %c0_i32 = arith.constant 0 : i32
    %c0_i32_0 = arith.constant 0 : i32
    return %arg0, %c0_i32 : i32, i32
  }
}

</mosaic_0001>

<bundles_post_ra>
// kernel: linear_proximal_forward.1
= control target key start
LH: loop header
LB: loop body
LE: loop exit
PB: predicated region body
PF: predicated region fallthrough
CT: control target
= control target key end

     0   :  { %vm38_vm0 = vcmask 326656   ;;  %v237_v0 = vmov 0.0   ;;  %vm238_vm1 = vmmov 0   ;;  %s333_s1 = inlined_call_operand.vmem [shape: f32[128,40], index: 1, kind: input, shape index: {}]   ;;  %s334_s0 = inlined_call_operand.vmem [shape: f32[8,40], index: 0, kind: input, shape index: {}]   ;;  %s335_s2 = inlined_call_operand.vmem [shape: f32[1,128], index: 2, kind: input, shape index: {}]   ;;  %s336_s3 = inlined_call_operand.vmem [shape: f32[8,128], index: 3, kind: output, shape index: {}]  }
   0x1   :  { %200 = vmatprep.subr.mxu0 %v237_v0  ;;  %v30_v1 = vld [vmem:[%s333_s1 + $0x78] sm:$0xff]  ;;  %232 = vmatprep.mubr.msk.f32.mxu0 %vm238_vm1, %v237_v0  ;;  %v29_v2 = vld [vmem:[%s333_s1 + $0x70] sm:$0xff]  ;;  %v28_v3 = vld [vmem:[%s333_s1 + $0x68] sm:$0xff] }
   0x2   :  { %201 = vmatpush3.xpose.msk.msra.mxu0 %vm38_vm0, %v30_v1  ;;  %v27_v4 = vld [vmem:[%s333_s1 + $0x60] sm:$0xff]  ;;  %v26_v5 = vld [vmem:[%s333_s1 + $0x58] sm:$0xff]  ;;  %v25_v6 = vld [vmem:[%s333_s1 + $0x50] sm:$0xff] }
   0x3   :  { %202 = vmatprep.subr.mxu0 %v237_v0  ;;  %v24_v7 = vld [vmem:[%s333_s1 + $0x48] sm:$0xff]  ;;  %v23_v8 = vld [vmem:[%s333_s1 + $0x40] sm:$0xff]  ;;  %v22_v9 = vld [vmem:[%s333_s1 + $0x38] sm:$0xff] }
   0x4   :  { %v21_v10 = vld [vmem:[%s333_s1 + $0x30] sm:$0xff]  ;;  %v20_v11 = vld [vmem:[%s333_s1 + $0x28] sm:$0xff]  ;;  %v19_v12 = vld [vmem:[%s333_s1 + $0x20] sm:$0xff] }
   0x5   :  { %v18_v13 = vld [vmem:[%s333_s1 + $0x18] sm:$0xff]  ;;  %v17_v14 = vld [vmem:[%s333_s1 + $0x10] sm:$0xff]  ;;  %v16_v15 = vld [vmem:[%s333_s1 + $0x8] sm:$0xff] }
   0x6   :  { %203 = vmatpush3.xpose.msk.msra.mxu0 %vm38_vm0, %v29_v2  ;;  %v15_v16 = vld [vmem:[%s333_s1] sm:$0xff] }
   0x7   :  { %204 = vmatprep.subr.mxu0 %v237_v0  ;;  %v14_v17 = vld [vmem:[%s334_s0] sm:$0xff] }
   0x8   :  { %v165_v18 = vld [vmem:[%s335_s2] ss:$0 sm:$0xff] }
   0xa   :  { %205 = vmatpush3.xpose.msk.msra.mxu0 %vm38_vm0, %v28_v3 }
   0xb   :  { %206 = vmatprep.subr.mxu0 %v237_v0 }
   0xe   :  { %207 = vmatpush3.xpose.msk.msra.mxu0 %vm38_vm0, %v27_v4 }
   0xf   :  { %208 = vmatprep.subr.mxu0 %v237_v0 }
  0x12   :  { %209 = vmatpush3.xpose.msk.msra.mxu0 %vm38_vm0, %v26_v5 }
  0x13   :  { %210 = vmatprep.subr.mxu0 %v237_v0 }
  0x16   :  { %211 = vmatpush3.xpose.msk.msra.mxu0 %vm38_vm0, %v25_v6 }
  0x17   :  { %212 = vmatprep.subr.mxu0 %v237_v0 }
  0x1a   :  { %213 = vmatpush3.xpose.msk.msra.mxu0 %vm38_vm0, %v24_v7 }
  0x1b   :  { %214 = vmatprep.subr.mxu0 %v237_v0 }
  0x1e   :  { %215 = vmatpush3.xpose.msk.msra.mxu0 %vm38_vm0, %v23_v8 }
  0x1f   :  { %216 = vmatprep.subr.mxu0 %v237_v0 }
  0x22   :  { %217 = vmatpush3.xpose.msk.msra.mxu0 %vm38_vm0, %v22_v9 }
  0x23   :  { %218 = vmatprep.subr.mxu0 %v237_v0 }
  0x26   :  { %219 = vmatpush3.xpose.msk.msra.mxu0 %vm38_vm0, %v21_v10 }
  0x27   :  { %220 = vmatprep.subr.mxu0 %v237_v0 }
  0x2a   :  { %221 = vmatpush3.xpose.msk.msra.mxu0 %vm38_vm0, %v20_v11 }
  0x2b   :  { %222 = vmatprep.subr.mxu0 %v237_v0 }
  0x2e   :  { %223 = vmatpush3.xpose.msk.msra.mxu0 %vm38_vm0, %v19_v12 }
  0x2f   :  { %224 = vmatprep.subr.mxu0 %v237_v0 }
  0x32   :  { %225 = vmatpush3.xpose.msk.msra.mxu0 %vm38_vm0, %v18_v13 }
  0x33   :  { %226 = vmatprep.subr.mxu0 %v237_v0 }
  0x36   :  { %227 = vmatpush3.xpose.msk.msra.mxu0 %vm38_vm0, %v17_v14 }
  0x37   :  { %228 = vmatprep.subr.mxu0 %v237_v0 }
  0x3a   :  { %229 = vmatpush3.xpose.msk.msra.mxu0 %vm38_vm0, %v16_v15 }
  0x3b   :  { %230 = vmatprep.subr.mxu0 %v237_v0 }
  0x3e   :  { %231 = vmatpush3.xpose.msk.msra.mxu0 %vm38_vm0, %v15_v16 }
  0x41   :  { %233 = vmatmul.mubr.msk.f32.vlgmr.msra.gmra.mxu0 %vm38_vm0, %v14_v17 }
 0x101   :  { %v156_v19 = vpop.f32.mrf.mxu0 }
 0x102   :  { %v157_v20 = vadd.f32 %v165_v18, %v156_v19 }
 0x103   :  { %v234_v21 = vpop.f32.mrf.mxu0 }
 0x104   :  { %160 = vst [vmem:[%s336_s3] sm:$0xff] %v157_v20 }

</bundles_post_ra>
